<compile_context>
chip_gen: v7x
topology: tpu7x:2x2x1
jax: 0.10.0
libtpu: 0.0.40
codegen_flags: <defaults>
</compile_context>

<pallas_src>
import jax
import jax.numpy as jnp
from jax.experimental import pallas as pl
from jax.experimental.pallas import tpu as pltpu

EPS = 1e-5   # BatchNorm1d default eps
K = 9        # conv kernel size
PAD = 4      # conv padding ("same")


def unet_down_kernel(x_ref, w1_ref, b1_ref, g1_ref, be1_ref,
                     w2_ref, b2_ref, g2_ref, be2_ref, o_ref):
    # x_ref: (2, N, Cin, Lh) f32 -- pool pair pre-split on the leading axis.
    N, Cin, Lh = x_ref.shape[1], x_ref.shape[2], x_ref.shape[3]
    Cout = o_ref.shape[1]
    M = N * Lh
    inv_m = 1.0 / float(M)

    # ---- MaxPool1d(2): pure element-wise max, L stays on lanes -------------------
    pooled = jnp.maximum(x_ref[0], x_ref[1])                      # (N, Cin, Lh) f32
    pooled = pooled.astype(jnp.bfloat16)                          # bf16 BEFORE 9x expansion

    # ---- layer 1: Conv1d as one batched bf16 matmul over a bf16 im2col slab ------
    zpad1 = jnp.zeros((N, Cin, PAD), jnp.bfloat16)
    xpad = jnp.concatenate([zpad1, pooled, zpad1], axis=2)        # (N, Cin, Lh+8) bf16
    im1 = jnp.concatenate([xpad[:, :, k:k + Lh] for k in range(K)],
                          axis=1)                                 # (N, K*Cin, Lh) bf16

    w1b = jnp.broadcast_to(w1_ref[...], (N, Cout, K * Cin))       # bf16, tiny
    y1 = jax.lax.dot_general(w1b, im1,
                             dimension_numbers=(((2,), (1,)), ((0,), (0,))),
                             preferred_element_type=jnp.float32)  # (N, Cout, Lh) f32
    y1 = y1 + b1_ref[...]                                         # (1, Cout, 1) bias

    # fused BatchNorm (training batch stats over N, L) + ReLU, all f32
    s1 = jnp.sum(y1, axis=(0, 2), keepdims=True)
    q1 = jnp.sum(y1 * y1, axis=(0, 2), keepdims=True)
    mean1 = s1 * inv_m
    var1 = jnp.maximum(q1 * inv_m - mean1 * mean1, 0.0)           # clamp: bf16-fed one-pass var
    scale1 = g1_ref[...] * jax.lax.rsqrt(var1 + EPS)
    shift1 = be1_ref[...] - mean1 * scale1
    y1 = jnp.maximum(y1 * scale1 + shift1, 0.0)                   # (N, Cout, Lh) f32

    # ---- layer 2: cast once to bf16, pad in bf16, same batched matmul ------------
    y1b = y1.astype(jnp.bfloat16)
    zpad2 = jnp.zeros((N, Cout, PAD), jnp.bfloat16)
    ypad = jnp.concatenate([zpad2, y1b, zpad2], axis=2)           # (N, Cout, Lh+8) bf16
    im2 = jnp.concatenate([ypad[:, :, k:k + Lh] for k in range(K)],
                          axis=1)                                 # (N, K*Cout, Lh) bf16

    w2b = jnp.broadcast_to(w2_ref[...], (N, Cout, K * Cout))
    y2 = jax.lax.dot_general(w2b, im2,
                             dimension_numbers=(((2,), (1,)), ((0,), (0,))),
                             preferred_element_type=jnp.float32)  # (N, Cout, Lh) f32
    y2 = y2 + b2_ref[...]

    s2 = jnp.sum(y2, axis=(0, 2), keepdims=True)
    q2 = jnp.sum(y2 * y2, axis=(0, 2), keepdims=True)
    mean2 = s2 * inv_m
    var2 = jnp.maximum(q2 * inv_m - mean2 * mean2, 0.0)
    scale2 = g2_ref[...] * jax.lax.rsqrt(var2 + EPS)
    shift2 = be2_ref[...] - mean2 * scale2

    # ---- single unmasked slab store, already NCL (lane-dense in Lh) --------------
    o_ref[...] = jnp.maximum(y2 * scale2 + shift2, 0.0)


def unet_down(x_ncl, params):
    """x_ncl: (N, Cin, L) float32 (L even). Returns (N, Cout, L // 2), like PyTorch."""
    w1, b1, g1, be1, w2, b2, g2, be2 = params
    N, Cin, L = x_ncl.shape
    Lh = L // 2
    Lhp = Lh + 2 * PAD
    Cout = w1.shape[0]

    x = x_ncl.astype(jnp.float32)
    # even/odd pool pair on a leading axis; keeps the native channel-major layout
    # (no full transpose, no halo pre-pad -- halo is built in-kernel).
    x_pairs = jnp.moveaxis(x.reshape(N, Cin, Lh, 2), -1, 0)       # (2, N, Cin, Lh)

    # weights folded for the im2col contraction: w_fold[o, k*C + c] = w[o, c, k]
    w1_2d = jnp.transpose(w1, (0, 2, 1)).reshape(Cout, K * Cin).astype(jnp.bfloat16)
    w2_2d = jnp.transpose(w2, (0, 2, 1)).reshape(Cout, K * Cout).astype(jnp.bfloat16)

    def chan(v):
        return v.reshape(1, Cout, 1).astype(jnp.float32)

    args = (x_pairs, w1_2d, chan(b1), chan(g1), chan(be1),
            w2_2d, chan(b2), chan(g2), chan(be2))

    vmem = pl.BlockSpec(memory_space=pltpu.MemorySpace.VMEM)

    # exact post-bf16 footprint (bytes) + headroom; cap per TPU generation
    footprint = (
        2 * N * Cin * Lh * 4                      # pooled pair input, f32
        + N * Cin * Lhp * 2                       # padded pooled, bf16
        + N * K * Cin * Lh * 2                    # layer-1 im2col, bf16
        + N * Cout * Lh * 4                       # y1, f32
        + N * Cout * Lhp * 2                      # padded y1, bf16
        + N * K * Cout * Lh * 2                   # layer-2 im2col, bf16
        + 2 * N * Cout * Lh * 4                   # y2 f32 + output
        + N * K * Cout * (Cin + Cout) * 2         # broadcast bf16 weights
    )
    try:
        vmem_cap = pltpu.get_tpu_info().vmem_capacity_bytes
    except Exception:
        vmem_cap = 128 * 1024 * 1024
    cap = int(0.75 * vmem_cap)                    # ~48 MiB on v7x, ~96 MiB on v5e/v6e
    vmem_limit = int(min(max(2 * footprint, 32 * 1024 * 1024), cap))

    out = pl.pallas_call(
        unet_down_kernel,
        out_shape=jax.ShapeDtypeStruct((N, Cout, Lh), jnp.float32),
        in_specs=[vmem] * len(args),
        out_specs=vmem,
        compiler_params=pltpu.CompilerParams(vmem_limit_bytes=vmem_limit),
    )(*args)
    return out                                                    # already NCL


def ref_unet_down(x, params):
    """Pure-JAX reference (independent implementation via lax.conv, f32 HIGHEST)."""
    w1, b1, g1, be1, w2, b2, g2, be2 = params
    N, C, L = x.shape
    xp = jnp.max(x.reshape(N, C, L // 2, 2), axis=-1)

    def block(t, w, b, g, beta):
        y = jax.lax.conv_general_dilated(
            t, w, window_strides=(1,), padding=[(PAD, PAD)],
            dimension_numbers=('NCH', 'OIH', 'NCH'),
            precision=jax.lax.Precision.HIGHEST)
        y = y + b[None, :, None]
        mean = jnp.mean(y, axis=(0, 2), keepdims=True)
        var = jnp.mean((y - mean) ** 2, axis=(0, 2), keepdims=True)
        y = (y - mean) / jnp.sqrt(var + EPS) * g[None, :, None] + beta[None, :, None]
        return jnp.maximum(y, 0.0)

    return block(block(xp, w1, b1, g1, be1), w2, b2, g2, be2)


if __name__ == "__main__":
    key = jax.random.PRNGKey(0)
    N, Cin, Cout, L = 2, 4, 8, 16
    ks = jax.random.split(key, 9)

    x = jax.random.normal(ks[0], (N, Cin, L), jnp.float32)

    # deterministic synthetic parameters (shapes from the module __init__)
    w1 = 0.1 * jax.random.normal(ks[1], (Cout, Cin, K), jnp.float32)
    b1 = 0.1 * jax.random.normal(ks[2], (Cout,), jnp.float32)
    g1 = 1.0 + 0.1 * jax.random.normal(ks[3], (Cout,), jnp.float32)
    be1 = 0.1 * jax.random.normal(ks[4], (Cout,), jnp.float32)
    w2 = 0.1 * jax.random.normal(ks[5], (Cout, Cout, K), jnp.float32)
    b2 = 0.1 * jax.random.normal(ks[6], (Cout,), jnp.float32)
    g2 = 1.0 + 0.1 * jax.random.normal(ks[7], (Cout,), jnp.float32)
    be2 = 0.1 * jax.random.normal(ks[8], (Cout,), jnp.float32)
    params = (w1, b1, g1, be1, w2, b2, g2, be2)

    out = unet_down(x, params)
    out = jax.block_until_ready(out)

    ref = ref_unet_down(x, params)
    assert out.shape == (N, Cout, L // 2), out.shape
    max_err = float(jnp.max(jnp.abs(out - ref)))
    # bf16 MXU inputs (f32 accumulate) vs f32-HIGHEST reference -> slightly looser tol
    assert jnp.allclose(out, ref, atol=2e-2, rtol=2e-2), max_err

    print("KERNEL_OK")
</pallas_src>

<mosaic_0001>
module attributes {stable_mosaic.version = 11 : i64} {
  func.func @unet_down_kernel(%arg0: memref<2x2x4x8xf32, #tpu.memory_space<vmem>>, %arg1: memref<8x36xbf16, #tpu.memory_space<vmem>>, %arg2: memref<1x8x1xf32, #tpu.memory_space<vmem>>, %arg3: memref<1x8x1xf32, #tpu.memory_space<vmem>>, %arg4: memref<1x8x1xf32, #tpu.memory_space<vmem>>, %arg5: memref<8x72xbf16, #tpu.memory_space<vmem>>, %arg6: memref<1x8x1xf32, #tpu.memory_space<vmem>>, %arg7: memref<1x8x1xf32, #tpu.memory_space<vmem>>, %arg8: memref<1x8x1xf32, #tpu.memory_space<vmem>>, %arg9: memref<2x8x8xf32, #tpu.memory_space<vmem>>) attributes {dimension_semantics = [], scalar_prefetch = 0 : i64, scratch_operands = 0 : i64, tpu.core_type = #tpu.core_type<tc>} {
    %c0 = arith.constant 0 : index
    %c0_0 = arith.constant 0 : index
    %c0_1 = arith.constant 0 : index
    %c0_2 = arith.constant 0 : index
    %0 = vector.load %arg0[%c0, %c0_0, %c0_1, %c0_2] : memref<2x2x4x8xf32, #tpu.memory_space<vmem>>, vector<1x2x4x8xf32>
    %1 = vector.shape_cast %0 : vector<1x2x4x8xf32> to vector<2x4x8xf32>
    %c1 = arith.constant 1 : index
    %c0_3 = arith.constant 0 : index
    %c0_4 = arith.constant 0 : index
    %c0_5 = arith.constant 0 : index
    %2 = vector.load %arg0[%c1, %c0_3, %c0_4, %c0_5] : memref<2x2x4x8xf32, #tpu.memory_space<vmem>>, vector<1x2x4x8xf32>
    %3 = vector.shape_cast %2 : vector<1x2x4x8xf32> to vector<2x4x8xf32>
    %4 = arith.maximumf %1, %3 : vector<2x4x8xf32>
    %5 = arith.truncf %4 : vector<2x4x8xf32> to vector<2x4x8xbf16>
    %cst = arith.constant 0.000000e+00 : bf16
    %6 = vector.broadcast %cst : bf16 to vector<2x4x4xbf16>
    %7 = tpu.concatenate %6, %5, %6 in 2 : vector<2x4x4xbf16>, vector<2x4x8xbf16>, vector<2x4x4xbf16> -> vector<2x4x16xbf16>
    %8 = vector.extract_strided_slice %7 {offsets = [0, 0, 0], sizes = [2, 4, 8], strides = [1, 1, 1]} : vector<2x4x16xbf16> to vector<2x4x8xbf16>
    %9 = vector.extract_strided_slice %7 {offsets = [0, 0, 1], sizes = [2, 4, 8], strides = [1, 1, 1]} : vector<2x4x16xbf16> to vector<2x4x8xbf16>
    %10 = vector.extract_strided_slice %7 {offsets = [0, 0, 2], sizes = [2, 4, 8], strides = [1, 1, 1]} : vector<2x4x16xbf16> to vector<2x4x8xbf16>
    %11 = vector.extract_strided_slice %7 {offsets = [0, 0, 3], sizes = [2, 4, 8], strides = [1, 1, 1]} : vector<2x4x16xbf16> to vector<2x4x8xbf16>
    %12 = vector.extract_strided_slice %7 {offsets = [0, 0, 4], sizes = [2, 4, 8], strides = [1, 1, 1]} : vector<2x4x16xbf16> to vector<2x4x8xbf16>
    %13 = vector.extract_strided_slice %7 {offsets = [0, 0, 5], sizes = [2, 4, 8], strides = [1, 1, 1]} : vector<2x4x16xbf16> to vector<2x4x8xbf16>
    %14 = vector.extract_strided_slice %7 {offsets = [0, 0, 6], sizes = [2, 4, 8], strides = [1, 1, 1]} : vector<2x4x16xbf16> to vector<2x4x8xbf16>
    %15 = vector.extract_strided_slice %7 {offsets = [0, 0, 7], sizes = [2, 4, 8], strides = [1, 1, 1]} : vector<2x4x16xbf16> to vector<2x4x8xbf16>
    %16 = vector.extract_strided_slice %7 {offsets = [0, 0, 8], sizes = [2, 4, 8], strides = [1, 1, 1]} : vector<2x4x16xbf16> to vector<2x4x8xbf16>
    %17 = tpu.concatenate %8, %9, %10, %11, %12, %13, %14, %15, %16 in 1 : vector<2x4x8xbf16>, vector<2x4x8xbf16>, vector<2x4x8xbf16>, vector<2x4x8xbf16>, vector<2x4x8xbf16>, vector<2x4x8xbf16>, vector<2x4x8xbf16>, vector<2x4x8xbf16>, vector<2x4x8xbf16> -> vector<2x36x8xbf16>
    %c0_6 = arith.constant 0 : index
    %c0_7 = arith.constant 0 : index
    %18 = vector.load %arg1[%c0_6, %c0_7] : memref<8x36xbf16, #tpu.memory_space<vmem>>, vector<8x36xbf16>
    %19 = vector.shape_cast %18 : vector<8x36xbf16> to vector<1x8x36xbf16>
    %20 = vector.broadcast %19 : vector<1x8x36xbf16> to vector<2x8x36xbf16>
    %cst_8 = arith.constant dense<0.000000e+00> : vector<2x8x8xf32>
    %21 = tpu.matmul %20, %17, %cst_8 {dimension_numbers = #tpu.dot_dimension_numbers<[2], [1], [1], [2], [0, 0, 0, 1, 1, 2], [0], [0]>} : vector<2x8x36xbf16>, vector<2x36x8xbf16>, vector<2x8x8xf32> -> vector<2x8x8xf32>
    %c0_9 = arith.constant 0 : index
    %c0_10 = arith.constant 0 : index
    %c0_11 = arith.constant 0 : index
    %22 = vector.load %arg2[%c0_9, %c0_10, %c0_11] : memref<1x8x1xf32, #tpu.memory_space<vmem>>, vector<1x8x1xf32>
    %23 = vector.broadcast %22 : vector<1x8x1xf32> to vector<2x8x8xf32>
    %24 = arith.addf %21, %23 : vector<2x8x8xf32>
    %cst_12 = arith.constant dense<0.000000e+00> : vector<8xf32>
    %25 = vector.multi_reduction <add>, %24, %cst_12 [0, 2] : vector<2x8x8xf32> to vector<8xf32>
    %26 = vector.shape_cast %25 : vector<8xf32> to vector<1x8x1xf32>
    %27 = arith.mulf %24, %24 : vector<2x8x8xf32>
    %cst_13 = arith.constant dense<0.000000e+00> : vector<8xf32>
    %28 = vector.multi_reduction <add>, %27, %cst_13 [0, 2] : vector<2x8x8xf32> to vector<8xf32>
    %29 = vector.shape_cast %28 : vector<8xf32> to vector<1x8x1xf32>
    %cst_14 = arith.constant 6.250000e-02 : f32
    %30 = vector.broadcast %cst_14 : f32 to vector<1x8x1xf32>
    %31 = arith.mulf %26, %30 : vector<1x8x1xf32>
    %cst_15 = arith.constant 6.250000e-02 : f32
    %32 = vector.broadcast %cst_15 : f32 to vector<1x8x1xf32>
    %33 = arith.mulf %29, %32 : vector<1x8x1xf32>
    %34 = arith.mulf %31, %31 : vector<1x8x1xf32>
    %35 = arith.subf %33, %34 : vector<1x8x1xf32>
    %cst_16 = arith.constant 0.000000e+00 : f32
    %36 = vector.broadcast %cst_16 : f32 to vector<1x8x1xf32>
    %37 = arith.maximumf %35, %36 : vector<1x8x1xf32>
    %c0_17 = arith.constant 0 : index
    %c0_18 = arith.constant 0 : index
    %c0_19 = arith.constant 0 : index
    %38 = vector.load %arg3[%c0_17, %c0_18, %c0_19] : memref<1x8x1xf32, #tpu.memory_space<vmem>>, vector<1x8x1xf32>
    %cst_20 = arith.constant 9.99999974E-6 : f32
    %39 = vector.broadcast %cst_20 : f32 to vector<1x8x1xf32>
    %40 = arith.addf %37, %39 : vector<1x8x1xf32>
    %41 = math.rsqrt %40 : vector<1x8x1xf32>
    %42 = arith.mulf %38, %41 : vector<1x8x1xf32>
    %c0_21 = arith.constant 0 : index
    %c0_22 = arith.constant 0 : index
    %c0_23 = arith.constant 0 : index
    %43 = vector.load %arg4[%c0_21, %c0_22, %c0_23] : memref<1x8x1xf32, #tpu.memory_space<vmem>>, vector<1x8x1xf32>
    %44 = arith.mulf %31, %42 : vector<1x8x1xf32>
    %45 = arith.subf %43, %44 : vector<1x8x1xf32>
    %46 = vector.broadcast %42 : vector<1x8x1xf32> to vector<2x8x8xf32>
    %47 = arith.mulf %24, %46 : vector<2x8x8xf32>
    %48 = vector.broadcast %45 : vector<1x8x1xf32> to vector<2x8x8xf32>
    %49 = arith.addf %47, %48 : vector<2x8x8xf32>
    %cst_24 = arith.constant 0.000000e+00 : f32
    %50 = vector.broadcast %cst_24 : f32 to vector<2x8x8xf32>
    %51 = arith.maximumf %49, %50 : vector<2x8x8xf32>
    %52 = arith.truncf %51 : vector<2x8x8xf32> to vector<2x8x8xbf16>
    %cst_25 = arith.constant 0.000000e+00 : bf16
    %53 = vector.broadcast %cst_25 : bf16 to vector<2x8x4xbf16>
    %54 = tpu.concatenate %53, %52, %53 in 2 : vector<2x8x4xbf16>, vector<2x8x8xbf16>, vector<2x8x4xbf16> -> vector<2x8x16xbf16>
    %55 = vector.extract_strided_slice %54 {offsets = [0, 0, 0], sizes = [2, 8, 8], strides = [1, 1, 1]} : vector<2x8x16xbf16> to vector<2x8x8xbf16>
    %56 = vector.extract_strided_slice %54 {offsets = [0, 0, 1], sizes = [2, 8, 8], strides = [1, 1, 1]} : vector<2x8x16xbf16> to vector<2x8x8xbf16>
    %57 = vector.extract_strided_slice %54 {offsets = [0, 0, 2], sizes = [2, 8, 8], strides = [1, 1, 1]} : vector<2x8x16xbf16> to vector<2x8x8xbf16>
    %58 = vector.extract_strided_slice %54 {offsets = [0, 0, 3], sizes = [2, 8, 8], strides = [1, 1, 1]} : vector<2x8x16xbf16> to vector<2x8x8xbf16>
    %59 = vector.extract_strided_slice %54 {offsets = [0, 0, 4], sizes = [2, 8, 8], strides = [1, 1, 1]} : vector<2x8x16xbf16> to vector<2x8x8xbf16>
    %60 = vector.extract_strided_slice %54 {offsets = [0, 0, 5], sizes = [2, 8, 8], strides = [1, 1, 1]} : vector<2x8x16xbf16> to vector<2x8x8xbf16>
    %61 = vector.extract_strided_slice %54 {offsets = [0, 0, 6], sizes = [2, 8, 8], strides = [1, 1, 1]} : vector<2x8x16xbf16> to vector<2x8x8xbf16>
    %62 = vector.extract_strided_slice %54 {offsets = [0, 0, 7], sizes = [2, 8, 8], strides = [1, 1, 1]} : vector<2x8x16xbf16> to vector<2x8x8xbf16>
    %63 = vector.extract_strided_slice %54 {offsets = [0, 0, 8], sizes = [2, 8, 8], strides = [1, 1, 1]} : vector<2x8x16xbf16> to vector<2x8x8xbf16>
    %64 = tpu.concatenate %55, %56, %57, %58, %59, %60, %61, %62, %63 in 1 : vector<2x8x8xbf16>, vector<2x8x8xbf16>, vector<2x8x8xbf16>, vector<2x8x8xbf16>, vector<2x8x8xbf16>, vector<2x8x8xbf16>, vector<2x8x8xbf16>, vector<2x8x8xbf16>, vector<2x8x8xbf16> -> vector<2x72x8xbf16>
    %c0_26 = arith.constant 0 : index
    %c0_27 = arith.constant 0 : index
    %65 = vector.load %arg5[%c0_26, %c0_27] : memref<8x72xbf16, #tpu.memory_space<vmem>>, vector<8x72xbf16>
    %66 = vector.shape_cast %65 : vector<8x72xbf16> to vector<1x8x72xbf16>
    %67 = vector.broadcast %66 : vector<1x8x72xbf16> to vector<2x8x72xbf16>
    %cst_28 = arith.constant dense<0.000000e+00> : vector<2x8x8xf32>
    %68 = tpu.matmul %67, %64, %cst_28 {dimension_numbers = #tpu.dot_dimension_numbers<[2], [1], [1], [2], [0, 0, 0, 1, 1, 2], [0], [0]>} : vector<2x8x72xbf16>, vector<2x72x8xbf16>, vector<2x8x8xf32> -> vector<2x8x8xf32>
    %c0_29 = arith.constant 0 : index
    %c0_30 = arith.constant 0 : index
    %c0_31 = arith.constant 0 : index
    %69 = vector.load %arg6[%c0_29, %c0_30, %c0_31] : memref<1x8x1xf32, #tpu.memory_space<vmem>>, vector<1x8x1xf32>
    %70 = vector.broadcast %69 : vector<1x8x1xf32> to vector<2x8x8xf32>
    %71 = arith.addf %68, %70 : vector<2x8x8xf32>
    %cst_32 = arith.constant dense<0.000000e+00> : vector<8xf32>
    %72 = vector.multi_reduction <add>, %71, %cst_32 [0, 2] : vector<2x8x8xf32> to vector<8xf32>
    %73 = vector.shape_cast %72 : vector<8xf32> to vector<1x8x1xf32>
    %74 = arith.mulf %71, %71 : vector<2x8x8xf32>
    %cst_33 = arith.constant dense<0.000000e+00> : vector<8xf32>
    %75 = vector.multi_reduction <add>, %74, %cst_33 [0, 2] : vector<2x8x8xf32> to vector<8xf32>
    %76 = vector.shape_cast %75 : vector<8xf32> to vector<1x8x1xf32>
    %cst_34 = arith.constant 6.250000e-02 : f32
    %77 = vector.broadcast %cst_34 : f32 to vector<1x8x1xf32>
    %78 = arith.mulf %73, %77 : vector<1x8x1xf32>
    %cst_35 = arith.constant 6.250000e-02 : f32
    %79 = vector.broadcast %cst_35 : f32 to vector<1x8x1xf32>
    %80 = arith.mulf %76, %79 : vector<1x8x1xf32>
    %81 = arith.mulf %78, %78 : vector<1x8x1xf32>
    %82 = arith.subf %80, %81 : vector<1x8x1xf32>
    %cst_36 = arith.constant 0.000000e+00 : f32
    %83 = vector.broadcast %cst_36 : f32 to vector<1x8x1xf32>
    %84 = arith.maximumf %82, %83 : vector<1x8x1xf32>
    %c0_37 = arith.constant 0 : index
    %c0_38 = arith.constant 0 : index
    %c0_39 = arith.constant 0 : index
    %85 = vector.load %arg7[%c0_37, %c0_38, %c0_39] : memref<1x8x1xf32, #tpu.memory_space<vmem>>, vector<1x8x1xf32>
    %cst_40 = arith.constant 9.99999974E-6 : f32
    %86 = vector.broadcast %cst_40 : f32 to vector<1x8x1xf32>
    %87 = arith.addf %84, %86 : vector<1x8x1xf32>
    %88 = math.rsqrt %87 : vector<1x8x1xf32>
    %89 = arith.mulf %85, %88 : vector<1x8x1xf32>
    %c0_41 = arith.constant 0 : index
    %c0_42 = arith.constant 0 : index
    %c0_43 = arith.constant 0 : index
    %90 = vector.load %arg8[%c0_41, %c0_42, %c0_43] : memref<1x8x1xf32, #tpu.memory_space<vmem>>, vector<1x8x1xf32>
    %91 = arith.mulf %78, %89 : vector<1x8x1xf32>
    %92 = arith.subf %90, %91 : vector<1x8x1xf32>
    %93 = vector.broadcast %89 : vector<1x8x1xf32> to vector<2x8x8xf32>
    %94 = arith.mulf %71, %93 : vector<2x8x8xf32>
    %95 = vector.broadcast %92 : vector<1x8x1xf32> to vector<2x8x8xf32>
    %96 = arith.addf %94, %95 : vector<2x8x8xf32>
    %cst_44 = arith.constant 0.000000e+00 : f32
    %97 = vector.broadcast %cst_44 : f32 to vector<2x8x8xf32>
    %98 = arith.maximumf %96, %97 : vector<2x8x8xf32>
    %c0_45 = arith.constant 0 : index
    %c0_46 = arith.constant 0 : index
    %c0_47 = arith.constant 0 : index
    %99 = vector.load %arg9[%c0_45, %c0_46, %c0_47] : memref<2x8x8xf32, #tpu.memory_space<vmem>>, vector<2x8x8xf32>
    tpu.vector_store %arg9[%c0_45, %c0_46, %c0_47], %98 {strides = array<i32>} : memref<2x8x8xf32, #tpu.memory_space<vmem>>, vector<2x8x8xf32>,
    return
  }
}

</mosaic_0001>

<bundles_post_ra>
// kernel: tpu_custom_call.1
= control target key start
LH: loop header
LB: loop body
LE: loop exit
PB: predicated region body
PF: predicated region fallthrough
CT: control target
= control target key end

     0   :  { %s838_s0 = inlined_call_operand.vmem [shape: f32[2,2,4,8], index: 0, kind: input, shape index: {}]   ;;  %s839_s1 = inlined_call_operand.vmem [shape: bf16[8,36], index: 1, kind: input, shape index: {}]   ;;  %s840_s2 = inlined_call_operand.vmem [shape: f32[1,8,1], index: 2, kind: input, shape index: {}]   ;;  %s841_s3 = inlined_call_operand.vmem [shape: f32[1,8,1], index: 3, kind: input, shape index: {}]   ;;  %s842_s4 = inlined_call_operand.vmem [shape: f32[1,8,1], index: 4, kind: input, shape index: {}]   ;;  %s843_s5 = inlined_call_operand.vmem [shape: bf16[8,72], index: 5, kind: input, shape index: {}]   ;;  %s844_s6 = inlined_call_operand.vmem [shape: f32[1,8,1], index: 6, kind: input, shape index: {}]   ;;  %s845_s7 = inlined_call_operand.vmem [shape: f32[1,8,1], index: 7, kind: input, shape index: {}]   ;;  %s846_s8 = inlined_call_operand.vmem [shape: f32[1,8,1], index: 8, kind: input, shape index: {}]   ;;  %s847_s9 = inlined_call_operand.hbm [shape: f32[2,8,8], index: 9, kind: output, shape index: {}]  }
   0x1   :  { %v34_v0 = vld [vmem:[%s838_s0] sm:$0xf]  ;;  %v504_v1 = vld [vmem:[%s838_s0 + $0x8] sm:$0xf]  ;;  %v35_v3 = vld [vmem:[%s838_s0 + $0x4] sm:$0xf] }
   0x2   :  { %v39_v2 = vmax.f32 %v34_v0, %v504_v1  ;;  %v505_v4 = vld [vmem:[%s838_s0 + $0xc] sm:$0xf] }
   0x3   :  { %v40_v5 = vmax.f32 %v35_v3, %v505_v4 }
   0x4   :  { %14 = vsyncpa [#allocation3], 0  ;;  %v41_v6 = vpack.c.bf16 %v39_v2, %v39_v2  ;;  %s623_s17 = smov 4   ;;  %vm49_vm0 = vcmask 31744   ;;  %vm55_vm1 = vcmask 97280   ;;  %v624_v8 = vmov 0.0  }
   0x5   :  { %v42_v7 = vpack.c.bf16 %v40_v5, %v40_v5  ;;  %530 = vmatprep.subr.bf16.mxu0 %v624_v8  ;;  %540 = vmatprep.subr.bf16.mxu1 %v624_v8  ;;  %s625_s0 = smov 124   ;;  %s626_s18 = smov 126   ;;  %vm632_vm2 = vmmov 0   ;;  %v132_v21 = vld [vmem:[%s840_s2] sm:$0xff]  ;;  %v634_v22 = vmov 0   ;;  %vm98_vm3 = vcmask 1041408  }
   0x6   :  { %45 = vrot.lane.b32.xlu0 %v41_v6, %s623_s17  ;;  %s627_s19 = smov 125   ;;  %s628_s20 = smov 127   ;;  %536 = vmatprep.mubr.msk.bf16.mxu0 %vm632_vm2, %v624_v8  ;;  %vm103_vm4 = vcmask 1043456   ;;  %vm108_vm5 = vcmask 1045504   ;;  %v131_v46 = vld [vmem:[%s839_s1] sm:$0xf] }
   0x7   :  { %s629_s21 = smov 123   ;;  %s630_s22 = smov 122   ;;  %546 = vmatprep.mubr.msk.bf16.mxu1 %vm632_vm2, %v624_v8  ;;  %593 = vset.pattern.permute.xlu0 %v634_v22  ;;  %vm138_vm6 = vcmask 293888   ;;  %vm228_vm7 = vcmask 64512   ;;  %vm356_vm8 = vcmask 588800  }
   0x8   :  { %s631_s23 = smov 121   ;;  %s633_s24 = smov 120   ;;  %594 = vset.pattern.permute.xlu1 %v634_v22 }
   0x9   :  { %s635_s14 = smov [#allocation2]  }
   0xa   :  { %47 = vrot.lane.b32.xlu0 %v42_v7, %s623_s17  ;;  %s493_s15 = sshll.u32 %s635_s14, 4  ;;  %s494_s15 = int_to_ptr.vmem [resolvable:$true] %s493_s15 }
   0xb   :  { %p604_p1 = scmp.lt.s32.totalorder %s494_s15, %s494_s15 }
  0x78   :  { %v46_v9 = vpop.permute.xlu0 %45 }
  0x79   :  { %v52_v10 = vsel %vm49_vm0, 0, %v46_v9 }
  0x7a   :  { %v56_v11 = vsel %vm55_vm1, %v52_v10, 0 }
  0x7b   :  { %78 = vrot.lane.b32.xlu0 %v56_v11, %s625_s0  ;;  %v66_v14 = vrot.slane %v56_v11, 4  ;;  %v72_v16 = vrot.slane %v56_v11, 2  ;;  %v60_v17 = vrot.slane %v56_v11, 6 }
  0x7c   :  { %v48_v12 = vpop.permute.xlu0 %47 }
  0x7d   :  { %v54_v13 = vsel %vm49_vm0, 0, %v48_v12 }
  0x7e   :  { %v57_v15 = vsel %vm55_vm1, %v54_v13, 0 }
  0x7f   :  { %68 = vrot.lane.b32.xlu0 %v66_v14, %s626_s18  ;;  %80 = vrot.lane.b32.xlu1 %v57_v15, %s625_s0  ;;  %v61_v18 = vrot.slane %v57_v15, 6  ;;  %v67_v19 = vrot.slane %v57_v15, 4  ;;  %v73_v20 = vrot.slane %v57_v15, 2 }
  0x83   :  { %74 = vrot.lane.b32.xlu0 %v72_v16, %s627_s19  ;;  %62 = vrot.lane.b32.xlu1 %v60_v17, %s628_s20 }
  0x87   :  { %82 = vrot.lane.b32.xlu0 %v60_v17, %s629_s21  ;;  %64 = vrot.lane.b32.xlu1 %v61_v18, %s628_s20 }
  0x8b   :  { %86 = vrot.lane.b32.xlu0 %v66_v14, %s630_s22  ;;  %70 = vrot.lane.b32.xlu1 %v67_v19, %s626_s18 }
  0x8f   :  { %90 = vrot.lane.b32.xlu0 %v72_v16, %s631_s23  ;;  %76 = vrot.lane.b32.xlu1 %v73_v20, %s627_s19 }
  0x93   :  { %94 = vrot.lane.b32.xlu0 %v56_v11, %s633_s24  ;;  %84 = vrot.lane.b32.xlu1 %v61_v18, %s629_s21  ;;  %v246_v18 = vld [vmem:[%s841_s3] sm:$0xff] }
  0x97   :  { %88 = vrot.lane.b32.xlu1 %v67_v19, %s630_s22  ;;  %135 = vperm.xlu0 %593, %v132_v21   ;;  %v250_v21 = vld [vmem:[%s842_s4] sm:$0xff] }
  0x9b   :  { %92 = vrot.lane.b32.xlu1 %v73_v20, %s631_s23 }
  0x9f   :  { %96 = vrot.lane.b32.xlu1 %v57_v15, %s633_s24 }
  0xed   :  { %v79_v23 = vpop.permute.xlu0 %78 }
  0xf1   :  { %v81_v24 = vpop.permute.xlu1 %80  ;;  %v69_v25 = vpop.permute.xlu0 %68 }
  0xf5   :  { %v63_v26 = vpop.permute.xlu1 %62  ;;  %v75_v27 = vpop.permute.xlu0 %74 }
  0xf6   :  { %v100_v28 = vsel %vm98_vm3, %v56_v11, %v63_v26 }
  0xf7   :  { %v105_v29 = vsel %vm103_vm4, %v100_v28, %v69_v25 }
  0xf8   :  { %v110_v30 = vsel %vm108_vm5, %v105_v29, %v75_v27 }
  0xf9   :  { %v65_v31 = vpop.permute.xlu1 %64  ;;  %531 = vmatpush3.bf16.msra.mxu0 %v110_v30  ;;  %v83_v32 = vpop.permute.xlu0 %82 }
  0xfa   :  { %532 = vmatprep.subr.bf16.mxu0 %v624_v8  ;;  %v102_v35 = vsel %vm98_vm3, %v57_v15, %v65_v31  ;;  %v117_v36 = vsel %vm98_vm3, %v79_v23, %v83_v32 }
  0xfd   :  { %v71_v33 = vpop.permute.xlu1 %70  ;;  %v87_v34 = vpop.permute.xlu0 %86 }
  0xfe   :  { %v107_v37 = vsel %vm103_vm4, %v102_v35, %v71_v33  ;;  %v122_v38 = vsel %vm103_vm4, %v117_v36, %v87_v34 }
 0x101   :  { %v77_v39 = vpop.permute.xlu1 %76  ;;  %v91_v40 = vpop.permute.xlu0 %90 }
 0x102   :  { %v126_v41 = vsel %vm108_vm5, %v122_v38, %v91_v40  ;;  %v113_v42 = vsel %vm108_vm5, %v107_v37, %v77_v39 }
 0x103   :  { %533 = vmatpush3.bf16.msra.mxu0 %v126_v41  ;;  %541 = vmatpush3.bf16.msra.mxu1 %v113_v42  ;;  %v350_v42 = vld [vmem:[%s844_s6] sm:$0xff] }
 0x104   :  { %534 = vmatprep.subr.bf16.mxu0 %v624_v8  ;;  %542 = vmatprep.subr.bf16.mxu1 %v624_v8 }
 0x105   :  { %v85_v43 = vpop.permute.xlu1 %84  ;;  %v95_v44 = vpop.permute.xlu0 %94 }
 0x106   :  { %v143_v45 = vsel %vm98_vm3, %v95_v44, 0  ;;  %v120_v48 = vsel %vm98_vm3, %v81_v24, %v85_v43 }
 0x107   :  { %535 = vmatpush3.bf16.msra.mxu0 %v143_v45 }
 0x108   :  { %550 = vmatprep.subr.bf16.mxu0 %v624_v8 }
 0x109   :  { %v89_v47 = vpop.permute.xlu1 %88 }
 0x10a   :  { %537 = vmatmul.mubr.msk.bf16.vlgmr.msra.gmra.mrb[0].mxu0 %vm138_vm6, %v131_v46  ;;  %v124_v49 = vsel %vm103_vm4, %v120_v48, %v89_v47 }
 0x10b   :  { %560 = vmatprep.mubr.msk.bf16.mxu0 %vm632_vm2, %v624_v8 }
 0x10d   :  { %v93_v50 = vpop.permute.xlu1 %92 }
 0x10e   :  { %v129_v51 = vsel %vm108_vm5, %v124_v49, %v93_v50 }
 0x10f   :  { %543 = vmatpush3.bf16.msra.mxu1 %v129_v51 }
 0x110   :  { %544 = vmatprep.subr.bf16.mxu1 %v624_v8 }
 0x111   :  { %v97_v52 = vpop.permute.xlu1 %96 }
 0x112   :  { %v186_v53 = vsel %vm98_vm3, %v97_v52, 0 }
 0x113   :  { %545 = vmatpush3.bf16.msra.mxu1 %v186_v53 }
 0x114   :  { %564 = vmatprep.subr.bf16.mxu1 %v624_v8 }
 0x116   :  { %547 = vmatmul.mubr.msk.bf16.vlgmr.msra.gmra.mrb[0].mxu1 %vm138_vm6, %v131_v46  ;;  %v136_v58 = vpop.permute.xlu0 %135 }
 0x117   :  { %574 = vmatprep.mubr.msk.bf16.mxu1 %vm632_vm2, %v624_v8 }
 0x1dd   :  { %v179_v54 = vpop.f32.mrb[0].mxu0 }
 0x1de   :  { %v538_v55 = vpop.f32.mrb[1].mxu0  ;;  %v180_v59 = vadd.f32 %v179_v54, %v136_v58 }
 0x1df   :  { %v182_v56 = vpop.f32.mrb[2].mxu0 }
 0x1e0   :  { %v539_v57 = vpop.f32.mrb[3].mxu0  ;;  %v234_v60 = vmul.f32 %v180_v59, %v180_v59  ;;  %v229_v0 = vsel %vm228_vm7, %v180_v59, 0.0 }
 0x1e2   :  { %v236_v5 = vsel %vm228_vm7, %v234_v60, 0.0 }
 0x1e9   :  { %v222_v61 = vpop.f32.mrb[0].mxu1 }
 0x1ea   :  { %v223_v62 = vadd.f32 %v222_v61, %v136_v58  ;;  %v548_v63 = vpop.f32.mrb[1].mxu1 }
 0x1eb   :  { %v225_v1 = vpop.f32.mrb[2].mxu1 }
 0x1ec   :  { %v549_v2 = vpop.f32.mrb[3].mxu1  ;;  %v230_v3 = vsel %vm228_vm7, %v223_v62, 0.0  ;;  %v235_v4 = vmul.f32 %v223_v62, %v223_v62 }
 0x1ed   :  { %v231_v6 = vadd.f32 %v230_v3, %v229_v0  ;;  %v349_v3 = vld [vmem:[%s843_s5] sm:$0xf] }
 0x1ee   :  { %v237_v7 = vsel %vm228_vm7, %v235_v4, 0.0 }
 0x1ef   :  { %232 = vadd.xlane.f32.xlu1 %v231_v6  ;;  %v238_v9 = vadd.f32 %v237_v7, %v236_v5 }
 0x1f1   :  { %239 = vadd.xlane.f32.xlu0 %v238_v9 }
 0x27c   :  { %v233_v10 = vpop.xlane.xlu1 %232 }
 0x27d   :  { %v241_v11 = vmul.f32 0.0625, %v233_v10 }
 0x27e   :  { %v240_v12 = vpop.xlane.xlu0 %239 }
 0x27f   :  { %v243_v13 = vmul.f32 %v241_v11, %v241_v11  ;;  %v242_v14 = vmul.f32 0.0625, %v240_v12 }
 0x281   :  { %v244_v15 = vsub.f32 %v242_v14, %v243_v13 }
 0x283   :  { %v245_v16 = vmax.f32 %v244_v15, 0.0 }
 0x285   :  { %v247_v17 = vadd.f32 1e-05, %v245_v16 }
 0x287   :  { %595 = vrsqrt.f32 %v247_v17 }
 0x291   :  { %v596_v19 = vpop.eup %595 }
 0x292   :  { %v249_v20 = vmul.f32 %v596_v19, %v246_v18 }
 0x294   :  { %255 = vperm.xlu1 %594, %v249_v20   ;;  %v251_v22 = vmul.f32 %v249_v20, %v241_v11 }
 0x296   :  { %v252_v23 = vsub.f32 %v250_v21, %v251_v22 }
 0x298   :  { %262 = vperm.xlu0 %593, %v252_v23  }
 0x313   :  { %v256_v24 = vpop.permute.xlu1 %255 }
 0x314   :  { %v258_v25 = vmul.f32 %v256_v24, %v180_v59  ;;  %v259_v26 = vmul.f32 %v256_v24, %v223_v62 }
 0x317   :  { %v263_v27 = vpop.permute.xlu0 %262 }
 0x318   :  { %v265_v28 = vadd.f32 %v263_v27, %v258_v25  ;;  %v266_v29 = vadd.f32 %v263_v27, %v259_v26 }
 0x31a   :  { %v267_v30 = vmax.f32 %v265_v28, 0.0  ;;  %v268_v31 = vmax.f32 %v266_v29, 0.0 }
 0x31c   :  { %v269_v32 = vpack.c.bf16 %v267_v30, %v267_v30  ;;  %v270_v33 = vpack.c.bf16 %v268_v31, %v268_v31 }
 0x31e   :  { %273 = vrot.lane.b32.xlu1 %v269_v32, %s623_s17 }
 0x322   :  { %275 = vrot.lane.b32.xlu1 %v270_v33, %s623_s17  ;;  %v463_v33 = vld [vmem:[%s845_s7] sm:$0xff]  ;;  %s599_s7 = scalar_lea.vmem %s494_s15, 256 }
 0x323   :  { %p600_p0 = scmp.ne.s32.totalorder %s494_s15, %s599_s7  ;;  %p605_p2 = scmp.lt.s32.totalorder %s599_s7, %s599_s7 }
 0x325   :  { %p606_p3 = por %p605_p2, %p604_p1 }
 0x327   :  { %p607_p4 = pnand %p606_p3, %p600_p0 }
 0x390   :  { %v274_v34 = vpop.permute.xlu1 %273 }
 0x391   :  { %v278_v35 = vsel %vm49_vm0, 0, %v274_v34 }
 0x392   :  { %v281_v36 = vsel %vm55_vm1, %v278_v35, 0 }
 0x393   :  { %291 = vrot.lane.b32.xlu0 %v281_v36, %s626_s18  ;;  %v285_v40 = vrot.slane %v281_v36, 4 }
 0x394   :  { %v276_v37 = vpop.permute.xlu1 %275 }
 0x395   :  { %v280_v38 = vsel %vm49_vm0, 0, %v276_v37 }
 0x396   :  { %v282_v39 = vsel %vm55_vm1, %v280_v38, 0 }
 0x397   :  { %299 = vrot.lane.b32.xlu0 %v281_v36, %s625_s0  ;;  %293 = vrot.lane.b32.xlu1 %v282_v39, %s626_s18  ;;  %v286_v41 = vrot.slane %v282_v39, 4 }
 0x39b   :  { %307 = vrot.lane.b32.xlu0 %v281_v36, %s630_s22  ;;  %301 = vrot.lane.b32.xlu1 %v282_v39, %s625_s0 }
 0x39f   :  { %287 = vrot.lane.b32.xlu0 %v285_v40, %s628_s20  ;;  %309 = vrot.lane.b32.xlu1 %v282_v39, %s630_s22 }
 0x3a3   :  { %295 = vrot.lane.b32.xlu0 %v285_v40, %s627_s19  ;;  %289 = vrot.lane.b32.xlu1 %v286_v41, %s628_s20 }
 0x3a7   :  { %303 = vrot.lane.b32.xlu0 %v285_v40, %s629_s21  ;;  %297 = vrot.lane.b32.xlu1 %v286_v41, %s627_s19 }
 0x3ab   :  { %311 = vrot.lane.b32.xlu0 %v285_v40, %s631_s23  ;;  %305 = vrot.lane.b32.xlu1 %v286_v41, %s629_s21 }
 0x3af   :  { %315 = vrot.lane.b32.xlu0 %v281_v36, %s633_s24  ;;  %313 = vrot.lane.b32.xlu1 %v286_v41, %s631_s23 }
 0x3b3   :  { %353 = vperm.xlu0 %593, %v350_v42   ;;  %317 = vrot.lane.b32.xlu1 %v282_v39, %s633_s24 }
 0x405   :  { %v292_v43 = vpop.permute.xlu0 %291 }
 0x409   :  { %v300_v44 = vpop.permute.xlu0 %299  ;;  %v294_v45 = vpop.permute.xlu1 %293 }
 0x40d   :  { %v308_v46 = vpop.permute.xlu0 %307  ;;  %v302_v47 = vpop.permute.xlu1 %301 }
 0x411   :  { %v288_v48 = vpop.permute.xlu0 %287  ;;  %v310_v49 = vpop.permute.xlu1 %309 }
 0x412   :  { %v320_v50 = vsel %vm103_vm4, %v281_v36, %v288_v48  ;;  %v467_v36 = vld [vmem:[%s846_s8] sm:$0xff] }
 0x413   :  { %551 = vmatpush3.bf16.msra.mxu0 %v320_v50 }
 0x414   :  { %552 = vmatprep.subr.bf16.mxu0 %v624_v8 }
 0x415   :  { %v296_v51 = vpop.permute.xlu0 %295  ;;  %v290_v52 = vpop.permute.xlu1 %289 }
 0x416   :  { %v327_v53 = vsel %vm103_vm4, %v292_v43, %v296_v51  ;;  %v323_v54 = vsel %vm103_vm4, %v282_v39, %v290_v52 }
 0x417   :  { %553 = vmatpush3.bf16.msra.mxu0 %v327_v53  ;;  %565 = vmatpush3.bf16.msra.mxu1 %v323_v54 }
 0x418   :  { %554 = vmatprep.subr.bf16.mxu0 %v624_v8  ;;  %566 = vmatprep.subr.bf16.mxu1 %v624_v8 }
 0x419   :  { %v304_v55 = vpop.permute.xlu0 %303  ;;  %v298_v56 = vpop.permute.xlu1 %297 }
 0x41a   :  { %v335_v57 = vsel %vm103_vm4, %v300_v44, %v304_v55  ;;  %v331_v58 = vsel %vm103_vm4, %v294_v45, %v298_v56 }
 0x41b   :  { %555 = vmatpush3.bf16.msra.mxu0 %v335_v57  ;;  %567 = vmatpush3.bf16.msra.mxu1 %v331_v58 }
 0x41c   :  { %556 = vmatprep.subr.bf16.mxu0 %v624_v8  ;;  %568 = vmatprep.subr.bf16.mxu1 %v624_v8 }
 0x41d   :  { %v312_v59 = vpop.permute.xlu0 %311  ;;  %v306_v60 = vpop.permute.xlu1 %305 }
 0x41e   :  { %v343_v61 = vsel %vm103_vm4, %v308_v46, %v312_v59  ;;  %v339_v62 = vsel %vm103_vm4, %v302_v47, %v306_v60 }
 0x41f   :  { %557 = vmatpush3.bf16.msra.mxu0 %v343_v61  ;;  %569 = vmatpush3.bf16.msra.mxu1 %v339_v62 }
 0x420   :  { %558 = vmatprep.subr.bf16.mxu0 %v624_v8  ;;  %570 = vmatprep.subr.bf16.mxu1 %v624_v8 }
 0x421   :  { %v316_v63 = vpop.permute.xlu0 %315  ;;  %v314_v0 = vpop.permute.xlu1 %313 }
 0x422   :  { %v361_v1 = vsel %vm103_vm4, %v316_v63, 0  ;;  %v347_v2 = vsel %vm103_vm4, %v310_v49, %v314_v0 }
 0x423   :  { %559 = vmatpush3.bf16.msra.mxu0 %v361_v1  ;;  %571 = vmatpush3.bf16.msra.mxu1 %v347_v2 }
 0x424   :  { %572 = vmatprep.subr.bf16.mxu1 %v624_v8 }
 0x425   :  { %v318_v4 = vpop.permute.xlu1 %317 }
 0x426   :  { %v404_v5 = vsel %vm103_vm4, %v318_v4, 0  ;;  %561 = vmatmul.mubr.msk.bf16.vlgmr.msra.gmra.mrb[4].mxu0 %vm356_vm8, %v349_v3 }
 0x427   :  { %573 = vmatpush3.bf16.msra.mxu1 %v404_v5 }
 0x42a   :  { %575 = vmatmul.mubr.msk.bf16.vlgmr.msra.gmra.mrb[4].mxu1 %vm356_vm8, %v349_v3 }
 0x432   :  { %v354_v6 = vpop.permute.xlu0 %353 }
 0x4f9   :  { %v397_v7 = vpop.f32.mrb[4].mxu0 }
 0x4fa   :  { %v398_v9 = vadd.f32 %v397_v7, %v354_v6  ;;  %v562_v10 = vpop.f32.mrb[5].mxu0 }
 0x4fb   :  { %v400_v11 = vpop.f32.mrb[6].mxu0 }
 0x4fc   :  { %v563_v12 = vpop.f32.mrb[7].mxu0  ;;  %v451_v16 = vmul.f32 %v398_v9, %v398_v9  ;;  %v446_v8 = vsel %vm228_vm7, %v398_v9, 0.0 }
 0x4fd   :  { %v440_v13 = vpop.f32.mrb[4].mxu1 }
 0x4fe   :  { %v441_v14 = vadd.f32 %v440_v13, %v354_v6  ;;  %v576_v15 = vpop.f32.mrb[5].mxu1  ;;  %v453_v22 = vsel %vm228_vm7, %v451_v16, 0.0 }
 0x4ff   :  { %v443_v17 = vpop.f32.mrb[6].mxu1 }
 0x500   :  { %v577_v18 = vpop.f32.mrb[7].mxu1  ;;  %v447_v19 = vsel %vm228_vm7, %v441_v14, 0.0  ;;  %v452_v20 = vmul.f32 %v441_v14, %v441_v14 }
 0x501   :  { %v448_v21 = vadd.f32 %v447_v19, %v446_v8 }
 0x502   :  { %v454_v23 = vsel %vm228_vm7, %v452_v20, 0.0 }
 0x503   :  { %449 = vadd.xlane.f32.xlu1 %v448_v21  ;;  %v455_v24 = vadd.f32 %v454_v23, %v453_v22 }
 0x505   :  { %456 = vadd.xlane.f32.xlu0 %v455_v24 }
 0x590   :  { %v450_v25 = vpop.xlane.xlu1 %449 }
 0x591   :  { %v458_v26 = vmul.f32 0.0625, %v450_v25 }
 0x592   :  { %v457_v27 = vpop.xlane.xlu0 %456 }
 0x593   :  { %v460_v28 = vmul.f32 %v458_v26, %v458_v26  ;;  %v459_v29 = vmul.f32 0.0625, %v457_v27 }
 0x595   :  { %v461_v30 = vsub.f32 %v459_v29, %v460_v28 }
 0x597   :  { %v462_v31 = vmax.f32 %v461_v30, 0.0 }
 0x599   :  { %v464_v32 = vadd.f32 1e-05, %v462_v31 }
 0x59b   :  { %597 = vrsqrt.f32 %v464_v32 }
 0x5a5   :  { %v598_v34 = vpop.eup %597 }
 0x5a6   :  { %v466_v35 = vmul.f32 %v598_v34, %v463_v33 }
 0x5a8   :  { %472 = vperm.xlu0 %593, %v466_v35   ;;  %v468_v37 = vmul.f32 %v466_v35, %v458_v26 }
 0x5aa   :  { %v469_v38 = vsub.f32 %v467_v36, %v468_v37 }
 0x5ac   :  { %479 = vperm.xlu1 %594, %v469_v38  }
 0x627   :  { %v473_v39 = vpop.permute.xlu0 %472 }
 0x628   :  { %v475_v40 = vmul.f32 %v473_v39, %v398_v9  ;;  %v476_v41 = vmul.f32 %v473_v39, %v441_v14 }
 0x62b   :  { %v480_v42 = vpop.permute.xlu1 %479 }
 0x62c   :  { %v482_v43 = vadd.f32 %v480_v42, %v475_v40  ;;  %v483_v44 = vadd.f32 %v480_v42, %v476_v41 }
 0x62e   :  { %v484_v45 = vmax.f32 %v482_v43, 0.0  ;;  %v485_v46 = vmax.f32 %v483_v44, 0.0 }
 0x630   :  { %486 = vst.msk [vmem:[#allocation2] sm:$0xff] %vm228_vm7, %v484_v45  ;;  %487 = vst.msk [vmem:[#allocation2 + $0x8] sm:$0xff] %vm228_vm7, %v485_v46 }
 0x631   :  { %610 = shalt.err (!%p607_p4)
}
 0x632   :  { %s611_s17 = scalar_lea.hbm %s847_s9, 256 }
 0x633   :  { %p612_p5 = scmp.ne.s32.totalorder %s847_s9, %s611_s17  ;;  %p615_p6 = scmp.lt.u32.totalorder %s611_s17, %s847_s9 }
 0x635   :  { %p617_p7 = pnand %p615_p6, %p612_p5 }
 0x637   :  { %620 = shalt.err (!%p617_p7)
}
 0x638   :  { %s636_s21 = smov 128   ;;  %s637_s22 = smov 8  }
 0x639   :  { %499 = dma.vmem_to_hbm [thread:$0]  %s494_s15, 256, %s847_s9, [#allocation3], %s636_s21, %s636_s21, %s637_s22  }
 0x63a   :  { %621 = dma.done.wait [#allocation3], 256  }
 0x63b   :  { %622 = vsyncadd [#allocation3], 4294967040 }
 0x63c   :  { %503 = vsyncpa [#allocation3], 1 }

</bundles_post_ra>
